<compile_context>
chip_gen: v7x
topology: tpu7x:2x2x1
jax: 0.10.0
libtpu: 0.0.40
codegen_flags: <defaults>
</compile_context>

<pallas_src>
import functools

import jax
import jax.numpy as jnp
from jax import lax
from jax.experimental import pallas as pl
from jax.experimental.pallas import tpu as pltpu


_MAX_PLANE_BATCH = 16            # static unroll bound in the whole-plane kernel
_SMALL_PLANE_BYTES = 256 << 10   # planes below this get grouped per grid step


def _vmem_capacity_bytes():
    """Physical VMEM per TensorCore (falls back to the v7x 64 MiB if unknown)."""
    try:
        info = pltpu.get_tpu_info()
        cap = getattr(info, "vmem_capacity_bytes", None)
        if cap:
            return int(cap)
    except Exception:
        pass
    return 64 << 20


def _budgets():
    """(row-tile budget, whole-plane-tile budget, scoped-VMEM limit) per generation."""
    cap = _vmem_capacity_bytes()
    if cap >= (96 << 20):                      # v5e / v6e: 128 MiB physical VMEM
        return 8 << 20, 5 << 20, 100 << 20
    return 4 << 20, 2 << 20, 48 << 20          # v7x: 64 MiB per TensorCore


def _padded_bytes(rows, cols, itemsize):
    """VMEM footprint of a (rows, cols) tile after (8, 128) layout padding."""
    return (-(-rows // 8) * 8) * (-(-cols // 128) * 128) * itemsize


# ----------------------------------------------------------------------------
# Kernel 1: TB whole (H, W) planes per grid step (no halos needed).
# ----------------------------------------------------------------------------
def _edge_mag_planes_kernel(x_ref, o_ref):
    TB, H, W = x_ref.shape
    dt = x_ref.dtype
    cmask = (lax.broadcasted_iota(jnp.int32, (1, W), 1) < W - 1).astype(dt)  # (1, W)
    rmask = (lax.broadcasted_iota(jnp.int32, (H, 1), 0) < H - 1).astype(dt)  # (H, 1)
    for p in range(TB):                      # static unroll, TB small
        xp = x_ref[p]                        # (H, W) channel-0 plane
        # x4: right-neighbor diff, zeroed at the last column BEFORE the roll so
        # the wrapped element is exactly the zero pad needed for x3.
        dh = (pltpu.roll(xp, shift=W - 1, axis=1) - xp) * cmask
        dh2 = dh * dh                                        # x4**2
        x3sq = pltpu.roll(dh2, shift=1, axis=1)              # x3**2
        # x1: below-neighbor diff, zeroed at the last row; x2**2 is its one-row
        # shift (wrapped element already zero).
        dv = (pltpu.roll(xp, shift=H - 1, axis=0) - xp) * rmask
        dv2 = dv * dv                                        # x1**2
        x2sq = pltpu.roll(dv2, shift=1, axis=0)              # x2**2
        o_ref[p] = jnp.sqrt(dh2 + x3sq + dv2 + x2sq)


# ----------------------------------------------------------------------------
# Kernel 2: one (TH, W) row tile; 8-row halos supply cross-tile neighbors.
# ----------------------------------------------------------------------------
def _edge_mag_rows_kernel(n_tiles, x_ref, below_ref, above_ref, o_ref):
    t = pl.program_id(0) % n_tiles
    is_first = t == 0
    is_last = t == n_tiles - 1

    x = x_ref[...]
    TH, W = x.shape
    halo = above_ref.shape[0]

    # Horizontal: x4 masked at the last column before the roll, so x3's wrapped
    # element is already the zero pad.  Only a (1, W) mask, no full-tile iota.
    cmask = (lax.broadcasted_iota(jnp.int32, (1, W), 1) < W - 1).astype(x.dtype)
    dh = (pltpu.roll(x, shift=W - 1, axis=1) - x) * cmask
    dh2 = dh * dh                                            # x4**2
    x3sq = pltpu.roll(dh2, shift=1, axis=1)                  # x3**2

    # Vertical: raw in-tile roll; rows 1..TH-2 are exact, the tile's first and
    # last rows are fixed below with 1-row stores (no full-tile selects).
    dvr = pltpu.roll(x, shift=TH - 1, axis=0) - x            # row TH-1 wraps
    dv2r = dvr * dvr                                         # x1**2 except row TH-1
    x2sq = pltpu.roll(dv2r, shift=1, axis=0)                 # x2**2 except row 0

    o_ref[...] = jnp.sqrt(dh2 + x3sq + dv2r + x2sq)

    # Last row of the tile: x1 uses the first "below" halo row (0 at the global
    # bottom).  Its x2**2 term (dv2r[TH-2] via the roll) is already correct.
    xl = x[TH - 1:TH, :]
    dvl = jnp.where(is_last, 0.0, below_ref[0:1, :] - xl)
    o_ref[TH - 1:TH, :] = jnp.sqrt(
        dh2[TH - 1:TH, :] + x3sq[TH - 1:TH, :] + dvl * dvl + x2sq[TH - 1:TH, :])

    # First row of the tile: x2 uses the last "above" halo row (0 at the global
    # top).  Its x1**2 term (dv2r[0]) is already correct.
    xf = x[0:1, :]
    dvf = jnp.where(is_first, 0.0, xf - above_ref[halo - 1:halo, :])
    o_ref[0:1, :] = jnp.sqrt(
        dh2[0:1, :] + x3sq[0:1, :] + dv2r[0:1, :] + dvf * dvf)


# ----------------------------------------------------------------------------
# Wrappers
# ----------------------------------------------------------------------------
def _blur_planes(x, TB, vmem_cap):
    B, C, H, W = x.shape
    itemsize = jnp.dtype(x.dtype).itemsize
    plane_bytes = _padded_bytes(H, W, itemsize)
    # double-buffered in/out blocks (4x) + ~6 per-plane temporaries + headroom
    vmem_need = 4 * TB * plane_bytes + 6 * plane_bytes + (4 << 20)
    vmem_limit = int(min(max(vmem_need, 32 << 20), vmem_cap))
    # TODO(synk): huge ragged-H planes (H % 8 != 0) land here with TB=1 and can
    # exceed the scoped-VMEM budget; pad H in the wrapper for those instead.

    return pl.pallas_call(
        _edge_mag_planes_kernel,
        out_shape=jax.ShapeDtypeStruct((B, H, W), x.dtype),
        grid_spec=pltpu.PrefetchScalarGridSpec(
            num_scalar_prefetch=0,
            grid=(B // TB,),
            in_specs=[pl.BlockSpec((TB, pl.Squeezed(), H, W),
                                   lambda i: (i, 0, 0, 0))],
            out_specs=pl.BlockSpec((TB, H, W), lambda i: (i, 0, 0)),
        ),
        compiler_params=pltpu.CompilerParams(
            dimension_semantics=("parallel",),
            vmem_limit_bytes=vmem_limit),
    )(x)


def _blur_rows(x, TH, vmem_cap):
    B, C, H, W = x.shape
    itemsize = jnp.dtype(x.dtype).itemsize
    n_tiles = H // TH
    halo = 8
    halo_stride = TH // halo
    n_halo_blocks = H // halo

    tile_bytes = _padded_bytes(TH, W, itemsize)
    halo_bytes = _padded_bytes(halo, W, itemsize)
    # double-buffered in/out tiles (4x) + ~6 tile-sized temporaries + halos + headroom
    vmem_need = 10 * tile_bytes + 4 * halo_bytes + (4 << 20)
    vmem_limit = int(min(max(vmem_need, 32 << 20), vmem_cap))

    def x_map(i):
        return (i // n_tiles, 0, i % n_tiles, 0)

    def below_map(i):
        blk = jnp.minimum((i % n_tiles + 1) * halo_stride, n_halo_blocks - 1)
        return (i // n_tiles, 0, blk, 0)

    def above_map(i):
        blk = jnp.maximum((i % n_tiles) * halo_stride - 1, 0)
        return (i // n_tiles, 0, blk, 0)

    def o_map(i):
        return (i // n_tiles, i % n_tiles, 0)

    return pl.pallas_call(
        functools.partial(_edge_mag_rows_kernel, n_tiles),
        out_shape=jax.ShapeDtypeStruct((B, H, W), x.dtype),
        grid_spec=pltpu.PrefetchScalarGridSpec(
            num_scalar_prefetch=0,
            grid=(B * n_tiles,),                 # flattened -> max parallel extent
            in_specs=[
                pl.BlockSpec((pl.Squeezed(), pl.Squeezed(), TH, W), x_map),
                pl.BlockSpec((pl.Squeezed(), pl.Squeezed(), halo, W), below_map),
                pl.BlockSpec((pl.Squeezed(), pl.Squeezed(), halo, W), above_map),
            ],
            out_specs=pl.BlockSpec((pl.Squeezed(), TH, W), o_map),
        ),
        compiler_params=pltpu.CompilerParams(
            dimension_semantics=("parallel",),
            vmem_limit_bytes=vmem_limit),
    )(x, x, x)


def _pick_tile_h(H, W, itemsize, max_tile_bytes):
    """Largest multiple-of-8 divisor of H whose (TH, W) tile fits the budget."""
    best = 8
    th = 8
    while th <= H:
        if H % th == 0 and _padded_bytes(th, W, itemsize) <= max_tile_bytes:
            best = th
        th += 8
    return best


def gaussian_blur(x, *, tile_h=None, plane_batch=None):
    """x: (B, C, H, W) float32 -> (B, H, W) edge magnitude of channel 0."""
    B, C, H, W = x.shape
    itemsize = jnp.dtype(x.dtype).itemsize
    rows_budget, planes_budget, vmem_cap = _budgets()
    plane_bytes = _padded_bytes(H, W, itemsize)

    if tile_h is not None:                        # explicit row tiling (testing hook)
        TH = int(tile_h)
        if TH >= H and H % 8 != 0:
            return _blur_planes(x, 1, vmem_cap)
        if TH > H or TH % 8 != 0 or H % TH != 0:
            raise ValueError(
                f"tile_h={TH} needs TH % 8 == 0 and H % TH == 0 (H={H})")
        return _blur_rows(x, TH, vmem_cap)

    if plane_batch is not None:                   # explicit plane batching (testing hook)
        TB = int(plane_batch)
        if not (1 <= TB <= B and B % TB == 0):
            raise ValueError(f"plane_batch={TB} must divide B={B}")
        return _blur_planes(x, TB, vmem_cap)

    # Default routing: row-tile big (or medium, low-batch) aligned planes so the
    # grid has enough parallel extent and each tile stays inside the per-gen
    # VMEM budget; otherwise process whole planes (batched when tiny) to
    # amortize the ~0.35us/step pipeline overhead and skip halo DMAs entirely.
    small_plane = plane_bytes <= _SMALL_PLANE_BYTES
    if H % 8 == 0 and (plane_bytes > planes_budget or (not small_plane and B < 4)):
        TH = _pick_tile_h(H, W, itemsize, rows_budget)
        # v7x has two TensorCores: keep at least ~4 parallel grid steps if possible.
        while TH > 8 and B * (H // TH) < 4:
            nxt = TH - 8
            while nxt >= 8 and H % nxt != 0:
                nxt -= 8
            if nxt < 8:
                break
            TH = nxt
        return _blur_rows(x, TH, vmem_cap)

    TB = 1
    if small_plane:
        budget_tb = min(_MAX_PLANE_BATCH, max(1, planes_budget // plane_bytes))
        for d in range(min(B, budget_tb), 0, -1):
            if B % d == 0 and (B // d) >= min(4, B):
                TB = d
                break
    return _blur_planes(x, TB, vmem_cap)


def gaussian_blur_ref(x):
    """Pure-JAX reference mirroring the torch forward exactly."""
    xb = x[:, 0]  # (B, H, W)
    B, H, W = xb.shape
    zrow = jnp.zeros((B, 1, W), xb.dtype)
    zcol = jnp.zeros((B, H, 1), xb.dtype)
    x1 = jnp.concatenate([xb[:, 1:, :] - xb[:, :-1, :], zrow], axis=1)
    x2 = jnp.concatenate([zrow, xb[:, :-1, :] - xb[:, 1:, :]], axis=1)
    x3 = jnp.concatenate([zcol, xb[:, :, :-1] - xb[:, :, 1:]], axis=2)
    x4 = jnp.concatenate([xb[:, :, 1:] - xb[:, :, :-1], zcol], axis=2)
    return jnp.sqrt(x1 ** 2 + x2 ** 2 + x3 ** 2 + x4 ** 2)


if __name__ == "__main__":
    key = jax.random.PRNGKey(0)
    x = jax.random.normal(key, (2, 4, 16, 16), dtype=jnp.float32)   # NCHW

    ref = gaussian_blur_ref(x)

    # Default routing (tiny planes -> whole-plane kernel).
    out = jax.block_until_ready(gaussian_blur(x))
    assert out.shape == (2, 16, 16), out.shape
    assert jnp.allclose(out, ref, atol=1e-5, rtol=1e-5), "mismatch (default / planes path)"

    # Batched planes: 2 planes per grid step.
    out_b = jax.block_until_ready(gaussian_blur(x, plane_batch=2))
    assert jnp.allclose(out_b, ref, atol=1e-5, rtol=1e-5), "mismatch (batched planes)"

    # Row-tiled halo path, multi-tile (2 tiles of 8 rows).
    out_t = jax.block_until_ready(gaussian_blur(x, tile_h=8))
    assert jnp.allclose(out_t, ref, atol=1e-5, rtol=1e-5), "mismatch (row-tiled, halo)"

    # Row-tiled path, single tile (exercises clamped halo index maps).
    out_s = jax.block_until_ready(gaussian_blur(x, tile_h=16))
    assert jnp.allclose(out_s, ref, atol=1e-5, rtol=1e-5), "mismatch (row-tiled, single tile)"

    print("KERNEL_OK")
</pallas_src>

<mosaic_0001>
module attributes {stable_mosaic.version = 11 : i64} {
  func.func @_edge_mag_planes_kernel(%arg0: i32, %arg1: memref<1x1x16x16xf32, #tpu.memory_space<vmem>>, %arg2: memref<1x16x16xf32, #tpu.memory_space<vmem>>) attributes {dimension_semantics = [#tpu.dimension_semantics<parallel>], iteration_bounds = array<i64: 2>, scalar_prefetch = 0 : i64, scratch_operands = 0 : i64, tpu.core_type = #tpu.core_type<tc>, window_params = [{transform_indices = @transform_0, window_bounds = array<i64: 1, 1, 16, 16>}, {transform_indices = @transform_1, window_bounds = array<i64: 1, 16, 16>}]} {
    %0 = tpu.iota {dimensions = array<i32: 1>} : vector<1x16xi32>
    %c15_i32 = arith.constant 15 : i32
    %1 = vector.broadcast %c15_i32 : i32 to vector<1x16xi32>
    %2 = arith.cmpi slt, %0, %1 : vector<1x16xi32>
    %3 = arith.extui %2 : vector<1x16xi1> to vector<1x16xi32>
    %4 = arith.sitofp %3 : vector<1x16xi32> to vector<1x16xf32>
    %5 = tpu.iota {dimensions = array<i32: 0>} : vector<16x1xi32>
    %c15_i32_0 = arith.constant 15 : i32
    %6 = vector.broadcast %c15_i32_0 : i32 to vector<16x1xi32>
    %7 = arith.cmpi slt, %5, %6 : vector<16x1xi32>
    %8 = arith.extui %7 : vector<16x1xi1> to vector<16x1xi32>
    %9 = arith.sitofp %8 : vector<16x1xi32> to vector<16x1xf32>
    %c0 = arith.constant 0 : index
    %c0_1 = arith.constant 0 : index
    %c0_2 = arith.constant 0 : index
    %c0_3 = arith.constant 0 : index
    %10 = vector.load %arg1[%c0, %c0_1, %c0_2, %c0_3] : memref<1x1x16x16xf32, #tpu.memory_space<vmem>>, vector<1x1x16x16xf32>
    %11 = vector.shape_cast %10 : vector<1x1x16x16xf32> to vector<16x16xf32>
    %c15_i32_4 = arith.constant 15 : i32
    %12 = tpu.dynamic_rotate %11 by %c15_i32_4 dim 1 : vector<16x16xf32>, i32 -> vector<16x16xf32>
    %13 = arith.subf %12, %11 : vector<16x16xf32>
    %14 = vector.broadcast %4 : vector<1x16xf32> to vector<16x16xf32>
    %15 = arith.mulf %13, %14 : vector<16x16xf32>
    %16 = arith.mulf %15, %15 : vector<16x16xf32>
    %c1_i32 = arith.constant 1 : i32
    %17 = tpu.dynamic_rotate %16 by %c1_i32 dim 1 : vector<16x16xf32>, i32 -> vector<16x16xf32>
    %c15_i32_5 = arith.constant 15 : i32
    %18 = tpu.dynamic_rotate %11 by %c15_i32_5 dim 0 : vector<16x16xf32>, i32 -> vector<16x16xf32>
    %19 = arith.subf %18, %11 : vector<16x16xf32>
    %20 = vector.broadcast %9 : vector<16x1xf32> to vector<16x16xf32>
    %21 = arith.mulf %19, %20 : vector<16x16xf32>
    %22 = arith.mulf %21, %21 : vector<16x16xf32>
    %c1_i32_6 = arith.constant 1 : i32
    %23 = tpu.dynamic_rotate %22 by %c1_i32_6 dim 0 : vector<16x16xf32>, i32 -> vector<16x16xf32>
    %24 = arith.addf %16, %17 : vector<16x16xf32>
    %25 = arith.addf %24, %22 : vector<16x16xf32>
    %26 = arith.addf %25, %23 : vector<16x16xf32>
    %27 = math.sqrt %26 : vector<16x16xf32>
    %c0_7 = arith.constant 0 : index
    %c0_8 = arith.constant 0 : index
    %c0_9 = arith.constant 0 : index
    %28 = vector.load %arg2[%c0_7, %c0_8, %c0_9] : memref<1x16x16xf32, #tpu.memory_space<vmem>>, vector<1x16x16xf32>
    %29 = vector.shape_cast %28 : vector<1x16x16xf32> to vector<16x16xf32>
    %30 = vector.shape_cast %27 : vector<16x16xf32> to vector<1x16x16xf32>
    tpu.vector_store %arg2[%c0_7, %c0_8, %c0_9], %30 {strides = array<i32>} : memref<1x16x16xf32, #tpu.memory_space<vmem>>, vector<1x16x16xf32>,
    return
  }
  func.func @transform_0(%arg0: i32) -> (i32, i32, i32, i32) {
    %c0_i32 = arith.constant 0 : i32
    %c0_i32_0 = arith.constant 0 : i32
    %c0_i32_1 = arith.constant 0 : i32
    %c0_i32_2 = arith.constant 0 : i32
    return %arg0, %c0_i32, %c0_i32_0, %c0_i32_1 : i32, i32, i32, i32
  }
  func.func @transform_1(%arg0: i32) -> (i32, i32, i32) {
    %c0_i32 = arith.constant 0 : i32
    %c0_i32_0 = arith.constant 0 : i32
    %c0_i32_1 = arith.constant 0 : i32
    return %arg0, %c0_i32, %c0_i32_0 : i32, i32, i32
  }
}

</mosaic_0001>

<bundles_post_ra>
// kernel: tpu_custom_call.1
= control target key start
LH: loop header
LB: loop body
LE: loop exit
PB: predicated region body
PF: predicated region fallthrough
CT: control target
= control target key end

     0   :  { %6 = vsyncpa [#allocation3], 0  ;;  %s749_s0 = inlined_call_operand.hbm [shape: f32[2,4,16,16], index: 0, kind: input, shape index: {}]   ;;  %s750_s1 = inlined_call_operand.hbm [shape: f32[2,16,16], index: 1, kind: output, shape index: {}]  }
   0x1   :  { %8 = vsyncpa [#allocation3 + $0x1], 0 }
   0x2   :  { %9 = vsyncpa [#allocation4], 0 }
   0x3   :  { %11 = vsyncpa [#allocation4 + $0x1], 0  ;;  %s556_s6 = smov 0   ;;  %s558_s7 = smov 0  }
   0x4   :  { %s560_s8 = smov 0   ;;  %s562_s9 = smov 0  }
   0x5 LB: > { %s577_s10 = sadd.s32 4294967295, %s533_s9   ;;  %s360_s11 = sadd.s32 4294967294, %s533_s9   ;;  %s533_s9 = sphi %s562_s9, %s763_s9   ;;  %s529_s8 = sphi %s560_s8, %s762_s8   ;;  %s525_s7 = sphi %s558_s7, %s761_s7   ;;  %s521_s6 = sphi %s556_s6, %s760_s6  }
   0x6   : > { %s581_s12 = sadd.s32 1, %s533_s9   ;;  %s24_s13 = sadd.s32 1, %s529_s8 }
   0x7   : > { %s21_s14 = ssub.s32 %s533_s9, %s581_s12  ;;  %p31_p0 = scmp.ne.s32.totalorder %s529_s8, %s525_s7 }
   0x8   : > { %p22_p1 = scmp.eq.s32.totalorder %s21_s14, 0  ;;  %p32_p2 = scmp.eq.s32.totalorder %s533_s9, 0 }
   0x9   : > { %p37_p3 = scmp.ne.s32.totalorder %s525_s7, %s521_s6  ;;  %p38_p4 = scmp.eq.s32.totalorder %s577_s10, 0 }
   0xa   : > { %s593_s15 = scalar_select %p22_p1, %s529_s8, %s24_s13  }
   0xb   : > { %p595_p5 = por %p32_p2, %p31_p0  ;;  %p599_p6 = por %p38_p4, %p37_p3 }
   0xc   : > { %p61_p7 = scmp.eq.s32.totalorder %s577_s10, 1  ;;  %p67_p8 = scmp.eq.s32.totalorder %s360_s11, 1 }
   0xd   : > { %p390_p10 = scmp.lt.s32.totalorder %s533_s9, 2  ;;  %s87_s20 = sand.u32 1, %s529_s8  }
   0xe   : > { %p606_p11 = por %p61_p7, %p31_p0  ;;  %p610_p12 = por %p67_p8, %p37_p3 }
   0xf   : > { %s376_s21 = sshll.u32 %s533_s9, 10  ;;  %s363_s22 = sshll.u32 %s87_s20, 4 }
  0x10   : > { %s754_s18 = scalar_select %p606_p11, 1, 0 }
  0x11   : > { %s755_s19 = scalar_select %p610_p12, 1, 0 }
  0x12   : > { %s619_s25 = scalar_lea.hbm %s749_s0, %s376_s21  ;;  %s91_s26 = scalar_lea.vmem [#allocation2], %s363_s22 }
  0x13   : > { %s98_s27 = sshll.u32 %s91_s26, 4  ;;  %p623_p13 = pnand %p390_p10, %p595_p5  ;;  %s627_s27 = int_to_ptr.vmem [resolvable:$true] %s98_s27 }
  0x14   : > { %s629_s29 = scalar_lea.sflag [#allocation3], %s87_s20  ;;  %s437_s30 = scalar_lea.hbm %s619_s25, 256 }
  0x15   : > { %p438_p0 = scmp.ne.s32.totalorder %s619_s25, %s437_s30  ;;  %p439_p1 = pneg %p623_p13 }
  0x16   : > { %s442_s4 = scalar_lea.hbm %s749_s0, 2048  ;;  %p443_p4 = scmp.lt.u32.totalorder %s619_s25, %s749_s0 }
  0x17   : > { %p440_p2 = pnand %p439_p1, %p438_p0  ;;  %p444_p5 = scmp.lt.u32.totalorder %s442_s4, %s437_s30 }
  0x18   : > { %p446_p8 = scmp.lt.u32.totalorder %s437_s30, %s619_s25 }
  0x19   : > { %p441_p3 = pneg %p440_p2  ;;  %p445_p7 = por %p444_p5, %p443_p4 }
  0x1b   : > { %p447_p10 = por %p446_p8, %p445_p7 }
  0x1d   : > { %p448_p9 = pnand %p447_p10, %p441_p3 }
  0x1f   : > { %451 = shalt.err (!%p448_p9)
}
  0x20   : > { %s452_s13 = scalar_lea.vmem %s627_s27, 256  ;;  %s535_s14 = smov [#allocation2]  }
  0x21   : > { %p453_p0 = scmp.ne.s32.totalorder %s627_s27, %s452_s13  ;;  %s457_s16 = sshll.u32 %s535_s14, 4  ;;  %s458_s16 = int_to_ptr.vmem [resolvable:$false] %s457_s16 }
  0x22   : > { %s459_s20 = scalar_lea.vmem %s458_s16, 512  ;;  %p460_p11 = scmp.lt.s32.totalorder %s627_s27, %s458_s16 }
  0x23   : > { %p455_p2 = pnand %p453_p0, %p439_p1  ;;  %p461_p4 = scmp.lt.s32.totalorder %s459_s20, %s452_s13 }
  0x25   : > { %p456_p12 = pneg %p455_p2  ;;  %p462_p5 = por %p461_p4, %p460_p11 }
  0x27   : > { %p463_p7 = pnand %p462_p5, %p456_p12 }
  0x29   : > { %466 = shalt.err (!%p463_p7)
}
  0x2a   : > { %s536_s21 = smov 128   ;;  %s537_s22 = smov 8  }
  0x2b   : > { %385 = dma.hbm_to_vmem [thread:$0]  (!%p623_p13), %s619_s25, 256, %s627_s27, %s629_s29, %s536_s21, %s536_s21, %s537_s22  }
  0x2c   : > { %p366_p9 = scmp.ge.s32.totalorder %s533_s9, 1  ;;  %p106_p1 = scmp.lt.s32.totalorder %s533_s9, 3 }
  0x2e   : > { %p107_p3 = pnand %p366_p9, %p106_p1 }
  0x2f   : > { %s660_s23 = sand.u32 (!%p107_p3), 1, %s525_s7  }
  0x30   : > { %110 = sbr.rel (%p107_p3) target bundleno = 915 (0x393), region = 24  ;;  %s367_s24 = sshll.u32 (!%p107_p3), %s660_s23, 4 }
  0x31   : > { %s113_s26 = scalar_lea.sflag (!%p107_p3), [#allocation3], %s660_s23  ;;  %s116_s30 = scalar_lea.vmem (!%p107_p3), [#allocation2], %s367_s24 }
  0x37   : > { %512 = dma.done.wait (%p599_p6), %s113_s26, 256  }
  0x38   : > { %514 = vsyncadd (%p599_p6), %s113_s26, 4294967040  ;;  %v135_v0 = vlaneseq  ;;  %v149_v1 = vld [vmem:[%s116_s30] sm:$0xff]  ;;  %s538_s25 = smov 16   ;;  %v150_v2 = vld [vmem:[%s116_s30 + $0x8] sm:$0xff]  ;;  %s539_s27 = smov 1   ;;  %v540_v4 = vmov 0.0  }
  0x39   : > { %152 = vrot.lane.b32.xlu0 %v149_v1, %s538_s25  ;;  %vm151_vm1 = vcmask 1047680   ;;  %s541_s17 = smov 127   ;;  %v202_v26 = vrot.slane %v149_v1, 1  ;;  %v203_v27 = vrot.slane %v150_v2, 1  ;;  %s542_s28 = smov 114   ;;  %vm270_vm9 = vcmask 130048  }
  0x3a   : > { %v136_v3 = vand.u32 127, %v135_v0  ;;  %v141_v25 = vshrl.u32 %v135_v0, 7  ;;  %s134_s29 = scalar_lea.vmem [#allocation5], %s367_s24  ;;  %s377_s3 = sshll.u32 %s577_s10, 8 }
  0x3b   : > { %s287_s2 = sshll.u32 %s134_s29, 4  ;;  %s705_s11 = scalar_lea.hbm %s750_s1, %s377_s3  ;;  %s700_s2 = int_to_ptr.vmem [resolvable:$true] %s287_s2 }
  0x3c   : > { %vm137_vm0 = vcmp.lt.s32.totalorder %v136_v3, 15  ;;  %vm204_vm2 = vcmp.lt.s32.totalorder %v141_v25, 7  ;;  %v142_v29 = vadd.s32 8, %v141_v25  ;;  %vm215_vm4 = vcmp.lt.s32.totalorder %v141_v25, 1  ;;  %s274_s13 = scalar_lea.sflag [#allocation4], %s660_s23  ;;  %s467_s14 = scalar_lea.vmem %s700_s2, 256 }
  0x3d   : > { %155 = vrot.lane.b32.xlu0 %v150_v2, %s538_s25  ;;  %v369_v5 = vsel %vm137_vm0, 1.0, %v540_v4  ;;  %v205_v28 = vsel %vm204_vm2, %v202_v26, %v203_v27  ;;  %v206_v32 = vsel %vm204_vm2, %v203_v27, %v202_v26  ;;  %p468_p6 = scmp.ne.s32.totalorder %s700_s2, %s467_s14  ;;  %p757_p11 = scmp.ne.s32.totalorder %s754_s18, 0 }
  0x3e   : > { %v207_v30 = vsub.f32 %v205_v28, %v149_v1  ;;  %vm144_vm3 = vcmp.lt.s32.totalorder %v142_v29, 15  ;;  %v208_v35 = vsub.f32 %v206_v32, %v150_v2  ;;  %s543_s16 = smov [#allocation5]  }
  0x3f   : > { %v370_v36 = vsel %vm144_vm3, 1.0, %v540_v4  ;;  %p469_p12 = pnand %p468_p6, %p757_p11  ;;  %s471_s10 = sshll.u32 %s543_s16, 4  ;;  %s472_s10 = int_to_ptr.vmem [resolvable:$false] %s471_s10 }
  0x40   : > { %v211_v34 = vmul.f32 %v207_v30, %v207_v30  ;;  %v210_v38 = vmul.f32 %v370_v36, %v208_v35  ;;  %s473_s20 = scalar_lea.vmem %s472_s10, 512  ;;  %p474_p8 = scmp.lt.s32.totalorder %s700_s2, %s472_s10 }
  0x41   : > { %166 = vrot.lane.b32.xlu0 %v149_v1, %s539_s27  ;;  %p470_p13 = pneg %p469_p12  ;;  %p475_p10 = scmp.lt.s32.totalorder %s473_s20, %s467_s14 }
  0x42   : > { %v212_v40 = vmul.f32 %v210_v38, %v210_v38  ;;  %v213_v41 = vrot.slane %v211_v34, 7 }
  0x43   : > { %p476_p0 = por %p475_p10, %p474_p8 }
  0x44   : > { %v214_v42 = vrot.slane %v212_v40, 7 }
  0x45   : > { %175 = vrot.lane.b32.xlu0 %v369_v5, %s539_s27  ;;  %p477_p2 = pnand %p476_p0, %p470_p13 }
  0x46   : > { %v217_v45 = vsel %vm215_vm4, %v214_v42, %v213_v41  ;;  %v216_v48 = vsel %vm215_vm4, %v213_v41, %v214_v42 }
  0xab   : > { %v153_v6 = vpop.permute.xlu0 %152 }
  0xac   : > { %v154_v7 = vsel %vm151_vm1, %v153_v6, %v149_v1 }
  0xad   : > { %158 = vrot.lane.b32.xlu1 %v154_v7, %s538_s25 }
  0xaf   : > { %v156_v8 = vpop.permute.xlu0 %155 }
  0xb0   : > { %v157_v9 = vsel %vm151_vm1, %v156_v8, %v150_v2 }
  0xb1   : > { %160 = vrot.lane.b32.xlu1 %v157_v9, %s538_s25 }
  0xb3   : > { %v167_v10 = vpop.permute.xlu0 %166 }
  0xb5   : > { %168 = vrot.lane.b32.xlu1 %v150_v2, %s539_s27 }
  0xb7   : > { %v176_v13 = vpop.permute.xlu0 %175 }
 0x11f   : > { %v159_v11 = vpop.permute.xlu1 %158 }
 0x120   : > { %v162_v12 = vsel %vm151_vm1, %v159_v11, %v149_v1 }
 0x121   : > { %v172_v14 = vsub.f32 %v162_v12, %v167_v10 }
 0x123   : > { %v178_v15 = vmul.f32 %v176_v13, %v172_v14  ;;  %v161_v16 = vpop.permute.xlu1 %160 }
 0x124   : > { %v163_v18 = vsel %vm151_vm1, %v161_v16, %v150_v2 }
 0x125   : > { %v180_v17 = vmul.f32 %v178_v15, %v178_v15 }
 0x127   : > { %v169_v19 = vpop.permute.xlu1 %168  ;;  %184 = vrot.lane.b32.xlu1 %v180_v17, %s541_s17 }
 0x128   : > { %v173_v20 = vsub.f32 %v163_v18, %v169_v19 }
 0x12a   : > { %v179_v21 = vmul.f32 %v176_v13, %v173_v20 }
 0x12c   : > { %v181_v22 = vmul.f32 %v179_v21, %v179_v21 }
 0x12e   : > { %186 = vrot.lane.b32.xlu0 %v181_v22, %s541_s17 }
 0x199   : > { %v185_v23 = vpop.permute.xlu1 %184 }
 0x19a   : > { %190 = vrot.lane.b32.xlu1 %v185_v23, %s538_s25 }
 0x1a0   : > { %v187_v24 = vpop.permute.xlu0 %186 }
 0x1a1   : > { %193 = vrot.lane.b32.xlu0 %v187_v24, %s538_s25 }
 0x20c   : > { %v191_v31 = vpop.permute.xlu1 %190 }
 0x20d   : > { %v192_v33 = vsel %vm151_vm1, %v191_v31, %v185_v23 }
 0x20e   : > { %196 = vrot.lane.b32.xlu1 %v192_v33, %s538_s25 }
 0x212   : > { %230 = vrot.lane.b32.xlu1 %v211_v34, %s539_s27 }
 0x213   : > { %v194_v37 = vpop.permute.xlu0 %193 }
 0x214   : > { %v195_v39 = vsel %vm151_vm1, %v194_v37, %v187_v24 }
 0x215   : > { %198 = vrot.lane.b32.xlu0 %v195_v39, %s538_s25 }
 0x219   : > { %232 = vrot.lane.b32.xlu0 %v212_v40, %s539_s27 }
 0x280   : > { %v197_v43 = vpop.permute.xlu1 %196 }
 0x281   : > { %v200_v44 = vsel %vm151_vm1, %v197_v43, %v185_v23 }
 0x282   : > { %220 = vrot.lane.b32.xlu1 %v200_v44, %s542_s28 }
 0x284   : > { %v231_v49 = vpop.permute.xlu1 %230 }
 0x286   : > { %240 = vrot.lane.b32.xlu1 %v217_v45, %s539_s27 }
 0x287   : > { %v199_v46 = vpop.permute.xlu0 %198 }
 0x288   : > { %v201_v47 = vsel %vm151_vm1, %v199_v46, %v187_v24 }
 0x289   : > { %222 = vrot.lane.b32.xlu0 %v201_v47, %s542_s28 }
 0x28b   : > { %v233_v52 = vpop.permute.xlu0 %232 }
 0x28d   : > { %242 = vrot.lane.b32.xlu0 %v216_v48, %s539_s27 }
 0x2f4   : > { %v221_v50 = vpop.permute.xlu1 %220 }
 0x2f5   : > { %v226_v51 = vadd.f32 %v221_v50, %v180_v17 }
 0x2f7   : > { %v236_v53 = vadd.f32 %v231_v49, %v226_v51 }
 0x2f8   : > { %v241_v54 = vpop.permute.xlu1 %240 }
 0x2f9   : > { %v246_v55 = vadd.f32 %v241_v54, %v236_v53 }
 0x2fb   : > { %433 = vrsqrt.f32 %v246_v55  ;;  %v223_v56 = vpop.permute.xlu0 %222  ;;  %vm250_vm5 = vcmp.eq.f32.partialorder %v246_v55, inf  ;;  %v253_v63 = vand.u32 2147483648, %v246_v55  ;;  %vm252_vm6 = vcmp.eq.f32.partialorder %v246_v55, 0.0 }
 0x2fc   : > { %v227_v57 = vadd.f32 %v223_v56, %v181_v22 }
 0x2fe   : > { %v237_v58 = vadd.f32 %v233_v52, %v227_v57 }
 0x2ff   : > { %v243_v59 = vpop.permute.xlu0 %242 }
 0x300   : > { %v247_v60 = vadd.f32 %v243_v59, %v237_v58 }
 0x302   : > { %435 = vrsqrt.f32 %v247_v60  ;;  %vm257_vm7 = vcmp.eq.f32.partialorder %v247_v60, inf  ;;  %v260_v4 = vand.u32 2147483648, %v247_v60  ;;  %vm259_vm8 = vcmp.eq.f32.partialorder %v247_v60, 0.0 }
 0x305   : > { %v434_v61 = vpop.eup %433 }
 0x306   : > { %v249_v62 = vmul.f32 %v434_v61, %v246_v55 }
 0x308   : > { %v251_v0 = vsel %vm250_vm5, %v246_v55, %v249_v62 }
 0x309   : > { %v254_v1 = vsel %vm252_vm6, %v253_v63, %v251_v0 }
 0x30a   : > { %264 = vrot.lane.b32.xlu1 %v254_v1, %s541_s17 }
 0x30c   : > { %v436_v2 = vpop.eup %435 }
 0x30d   : > { %v256_v3 = vmul.f32 %v436_v2, %v247_v60 }
 0x30f   : > { %v258_v5 = vsel %vm257_vm7, %v247_v60, %v256_v3 }
 0x310   : > { %v261_v6 = vsel %vm259_vm8, %v260_v4, %v258_v5 }
 0x311   : > { %266 = vrot.lane.b32.xlu0 %v261_v6, %s541_s17 }
 0x37c   : > { %v265_v7 = vpop.permute.xlu1 %264 }
 0x37d   : > { %271 = vst.msk [vmem:[%s134_s29] sm:$0xff] %vm270_vm9, %v265_v7 }
 0x383   : > { %v267_v8 = vpop.permute.xlu0 %266 }
 0x384   : > { %272 = vst.msk [vmem:[%s134_s29 + $0x8] sm:$0xff] %vm270_vm9, %v267_v8 }
 0x385   : > { %480 = shalt.err (!%p477_p2)
}
 0x386   : > { %s481_s21 = scalar_lea.hbm %s705_s11, 256  ;;  %s485_s26 = scalar_lea.hbm %s750_s1, 512 }
 0x387   : > { %p482_p4 = scmp.ne.s32.totalorder %s705_s11, %s481_s21  ;;  %p486_p9 = scmp.lt.u32.totalorder %s705_s11, %s750_s1 }
 0x388   : > { %p487_p1 = scmp.lt.u32.totalorder %s485_s26, %s481_s21  ;;  %p489_p6 = scmp.lt.u32.totalorder %s481_s21, %s705_s11 }
 0x389   : > { %p483_p5 = pnand %p482_p4, %p757_p11 }
 0x38a   : > { %p488_p3 = por %p487_p1, %p486_p9 }
 0x38b   : > { %p484_p7 = pneg %p483_p5 }
 0x38c   : > { %p490_p12 = por %p489_p6, %p488_p3 }
 0x38e   : > { %p491_p13 = pnand %p490_p12, %p484_p7 }
 0x390   : > { %494 = shalt.err (!%p491_p13)
}
 0x391   : > { %s544_s27 = smov 128   ;;  %s545_s17 = smov 8  }
 0x392   : > { %380 = dma.vmem_to_hbm [thread:$0]  (%p757_p11), %s700_s2, 256, %s705_s11, %s274_s13, %s544_s27, %s544_s27, %s545_s17  }
 0x393 PF: > { %s302_s28 = sand.u32 1, %s521_s6   ;;  %p758_p8 = scmp.ne.s32.totalorder %s755_s19, 0 }
 0x394   : > { %p759_p10 = scmp.ge.s32.totalorder %s533_s9, 2  ;;  %s303_s29 = scalar_lea.sflag [#allocation4], %s302_s28 }
 0x396   : > { %p387_p0 = pnand %p759_p10, %p758_p8 }
 0x398   : > { %516 = dma.done.wait (!%p387_p0), %s303_s29, 256  }
 0x399   : > { %518 = vsyncadd (!%p387_p0), %s303_s29, 4294967040  ;;  %p14_p2 = scmp.ge.s32.totalorder %s581_s12, 4   ;;  %s760_s6 = smov %s525_s7 }
 0x39a   : > { %s761_s7 = smov %s529_s8  ;;  %s762_s8 = smov %s593_s15 }
 0x39b   : > { %s763_s9 = smov %s581_s12  ;;  %16 = sbr.rel (!%p14_p2) target bundleno = 5 (0x5), region = 69 }
 0x3a2   :  { %308 = vsyncpa [#allocation3], 1 }
 0x3a3   :  { %310 = vsyncpa [#allocation3 + $0x1], 1 }
 0x3a4   :  { %311 = vsyncpa [#allocation4], 1 }
 0x3a5   :  { %313 = vsyncpa [#allocation4 + $0x1], 1 }

</bundles_post_ra>
